<compile_context>
chip_gen: v7x
topology: tpu7x:2x2x1
jax: 0.10.0
libtpu: 0.0.40
codegen_flags: <defaults>
</compile_context>

<pallas_src>
import functools

import jax
import jax.numpy as jnp
from jax.experimental import pallas as pl
from jax.experimental.pallas import tpu as pltpu


_TARGET_BLOCK_ELEMS = 1024 * 512   # ~2 MiB per f32 buffer per block
_PALLAS_MIN_ELEMS = 1 << 20        # below ~4 MiB, let XLA fuse the multiply instead


def _scale_kernel(s_ref, x_ref, o_ref):
    # s_ref: (1,) f32 scalar in SMEM (scalar-prefetch); x_ref/o_ref: lane-dense VMEM tiles.
    o_ref[...] = x_ref[...] * s_ref[0].astype(x_ref.dtype)


@functools.partial(jax.jit, static_argnames=("force_pallas",))
def scalar_forward(x, scalar, *, force_pallas=False):
    """Equivalent of Scalar.forward: x * scalar (scalar broadcast over all dims)."""
    s_f32 = jnp.asarray(scalar, dtype=jnp.float32).reshape(-1)[:1]   # (1,) f32
    total = x.size

    # Pallas only wins when the tensor is big enough to hide launch overhead and its
    # element count is lane-aligned (multiple of 128) so we can view it as a lane-dense
    # 2-D slab *without any pad/copy*.  Otherwise a plain XLA multiply is already at the
    # 1-read + 1-write HBM floor and fuses with neighboring ops.
    lane_aligned = (total % 128) == 0
    if not lane_aligned or (total < _PALLAS_MIN_ELEMS and not force_pallas):
        return (x * s_f32[0]).astype(x.dtype)

    # Collapse to (rows, width): width = largest of {512,256,128} dividing the element
    # count -> fully lane-dense, unmasked stores; reshape is a bitcast under jit.
    width = next(w for w in (512, 256, 128) if total % w == 0)
    rows = total // width
    x2d = x.reshape(rows, width)

    # ~2 MiB blocks.  _TARGET_BLOCK_ELEMS // width is always a multiple of 8, so the
    # sublane (8) constraint holds whenever tile_rows != rows; when tile_rows == rows
    # it is the full-extent block, which is always legal.
    tile_rows = min(rows, _TARGET_BLOCK_ELEMS // width)
    if tile_rows == rows and rows >= 16:
        # Split a would-be single-block launch into >=2 grid steps so both of v7x's
        # TensorCores get work (no-op cost on v5e/v6e).
        tile_rows = ((rows + 15) // 16) * 8

    grid = (pl.cdiv(rows, tile_rows),)

    out2d = pl.pallas_call(
        _scale_kernel,
        out_shape=jax.ShapeDtypeStruct(x2d.shape, x2d.dtype),
        grid_spec=pltpu.PrefetchScalarGridSpec(
            num_scalar_prefetch=1,                       # scalar -> SMEM, once
            grid=grid,
            in_specs=[pl.BlockSpec((tile_rows, width), lambda i, s: (i, 0))],
            out_specs=pl.BlockSpec((tile_rows, width), lambda i, s: (i, 0)),
        ),
        compiler_params=pltpu.CompilerParams(
            dimension_semantics=("parallel",),           # shard rows across v7x's 2 TCs
        ),
        # NOTE: no input_output_aliases -- x is not donated by callers here; a must-alias
        # on a live operand would force XLA to insert a defensive full copy of x.
    )(s_f32, x2d)

    return out2d.reshape(x.shape)


if __name__ == "__main__":
    key = jax.random.PRNGKey(0)

    # Parameter init matching torch.ones(1)[None,None,None] -> shape (1,1,1,1), value 1.0.
    scalar_param = jnp.ones((1, 1, 1, 1), dtype=jnp.float32)

    # Small shape implied by the module; force the Pallas path so the kernel runs
    # even though a tensor this tiny would normally take the fused-XLA fallback.
    x_small = jax.random.normal(key, (2, 4, 16, 16), dtype=jnp.float32)
    out_small = jax.block_until_ready(
        scalar_forward(x_small, scalar_param, force_pallas=True))
    ref_small = x_small * scalar_param
    assert out_small.shape == x_small.shape
    assert jnp.allclose(out_small, ref_small, atol=0, rtol=0)

    # Larger input (>= _PALLAS_MIN_ELEMS): exercises the natural Pallas path with a
    # multi-step, double-buffered grid (grid=(2,), 2 MiB blocks).
    x_big = jax.random.normal(jax.random.PRNGKey(1), (8, 8, 128, 128),
                              dtype=jnp.float32)
    scalar_half = jnp.full((1, 1, 1, 1), 0.5, dtype=jnp.float32)
    out_big = jax.block_until_ready(scalar_forward(x_big, scalar_half))
    ref_big = x_big * scalar_half
    assert out_big.shape == x_big.shape
    assert jnp.allclose(out_big, ref_big, rtol=1e-6, atol=0)

    print("KERNEL_OK")
</pallas_src>

<mosaic_0001>
module attributes {stable_mosaic.version = 11 : i64} {
  func.func @_scale_kernel(%arg0: i32, %arg1: memref<1xf32, #tpu.memory_space<smem>>, %arg2: memref<4x512xf32, #tpu.memory_space<vmem>>, %arg3: memref<4x512xf32, #tpu.memory_space<vmem>>) attributes {dimension_semantics = [#tpu.dimension_semantics<parallel>], iteration_bounds = array<i64: 1>, scalar_prefetch = 1 : i64, scratch_operands = 0 : i64, tpu.core_type = #tpu.core_type<tc>, window_params = [{transform_indices = @transform_0, window_bounds = array<i64: 4, 512>}, {transform_indices = @transform_1, window_bounds = array<i64: 4, 512>}]} {
    %c0 = arith.constant 0 : index
    %c0_0 = arith.constant 0 : index
    %0 = vector.load %arg2[%c0, %c0_0] : memref<4x512xf32, #tpu.memory_space<vmem>>, vector<4x512xf32>
    %c0_1 = arith.constant 0 : index
    %1 = memref.load %arg1[%c0_1] : memref<1xf32, #tpu.memory_space<smem>>
    %2 = vector.broadcast %1 : f32 to vector<4x512xf32>
    %3 = arith.mulf %0, %2 : vector<4x512xf32>
    %c0_2 = arith.constant 0 : index
    %c0_3 = arith.constant 0 : index
    %4 = vector.load %arg3[%c0_2, %c0_3] : memref<4x512xf32, #tpu.memory_space<vmem>>, vector<4x512xf32>
    tpu.vector_store %arg3[%c0_2, %c0_3], %3 {strides = array<i32>} : memref<4x512xf32, #tpu.memory_space<vmem>>, vector<4x512xf32>,
    return
  }
  func.func @transform_0(%arg0: i32, %arg1: memref<1xf32, #tpu.memory_space<smem>>) -> (i32, i32) {
    %c0_i32 = arith.constant 0 : i32
    %c0_i32_0 = arith.constant 0 : i32
    return %arg0, %c0_i32 : i32, i32
  }
  func.func @transform_1(%arg0: i32, %arg1: memref<1xf32, #tpu.memory_space<smem>>) -> (i32, i32) {
    %c0_i32 = arith.constant 0 : i32
    %c0_i32_0 = arith.constant 0 : i32
    return %arg0, %c0_i32 : i32, i32
  }
}

</mosaic_0001>

<bundles_post_ra>
// kernel: scalar_forward.1
= control target key start
LH: loop header
LB: loop body
LE: loop exit
PB: predicated region body
PF: predicated region fallthrough
CT: control target
= control target key end

     0   :  { %s52_s0 = inlined_call_operand.<no memory space> [shape: f32[1], index: 0, kind: input, shape index: {}]   ;;  %s53_s1 = inlined_call_operand.vmem [shape: f32[4,512], index: 1, kind: input, shape index: {}]   ;;  %s54_s2 = inlined_call_operand.vmem [shape: f32[4,512], index: 2, kind: output, shape index: {}]  }
   0x1   :  { %v10_v0 = vld [vmem:[%s53_s1] sm:$0xff]  ;;  %v13_v1 = vstv %s52_s0  ;;  %v11_v2 = vld [vmem:[%s53_s1 + $0x8] sm:$0xff] }
   0x2   :  { %v14_v3 = vmul.f32 %v13_v1, %v10_v0  ;;  %v15_v4 = vmul.f32 %v13_v1, %v11_v2 }
   0x4   :  { %16 = vst [vmem:[%s54_s2] sm:$0xff] %v14_v3  ;;  %17 = vst [vmem:[%s54_s2 + $0x8] sm:$0xff] %v15_v4 }

</bundles_post_ra>
